<compile_context>
chip_gen: v6e
topology: v6e:2x2x1
jax: 0.10.0
libtpu: 0.0.40
codegen_flags: <defaults>
</compile_context>

<pallas_src>
import functools

import jax
import jax.numpy as jnp
from jax import lax
from jax.experimental import pallas as pl
from jax.experimental.pallas import tpu as pltpu

LANES = 128
MAX_BLOCK_ROWS = 2048      # 2048 x 128 x 4B = 1 MiB per input per grid step (f32)
NUM_CORE_SPLIT = 2         # outer "parallel" axis -> one shard per TensorCore on v7x
_LOG_CLAMP = -100.0        # torch.nn.BCELoss clamps log() outputs at -100


def _bce_dice_sums_kernel(x_ref, t_ref, out_ref, *, block_rows, blocks_per_core,
                          n_rows):
    """Accumulates per-lane partial sums of [bce, p*t, p, t] into out_ref."""
    c = pl.program_id(0)          # core-split index
    j = pl.program_id(1)          # reduction step within this core's shard

    @pl.when(j == 0)
    def _():
        out_ref[...] = jnp.zeros_like(out_ref)

    # Global block / row offset (unclamped; used only for masking ragged /
    # duplicated tail blocks).
    blk = c * blocks_per_core + j
    row0 = blk * block_rows
    row_ids = lax.broadcasted_iota(jnp.int32, (block_rows, 1), 0) + row0
    valid = row_ids < n_rows                                  # (block_rows, 1)

    # Sanitize first so garbage in out-of-bounds rows never reaches the logs.
    p = jnp.where(valid, x_ref[...].astype(jnp.float32), 0.0)
    t = jnp.where(valid, t_ref[...].astype(jnp.float32), 0.0)

    # BCE with PyTorch's log clamp; masked / zero-padded (p=0, t=0) elements
    # contribute exactly 0 to every sum.
    log_p = jnp.maximum(jnp.log(p), _LOG_CLAMP)
    log_1mp = jnp.maximum(jnp.log(1.0 - p), _LOG_CLAMP)
    bce = -(t * log_p + (1.0 - t) * log_1mp)

    partial = jnp.concatenate(
        [jnp.sum(bce, axis=0, keepdims=True),
         jnp.sum(p * t, axis=0, keepdims=True),
         jnp.sum(p, axis=0, keepdims=True),
         jnp.sum(t, axis=0, keepdims=True)],
        axis=0)                                               # (4, LANES)
    out_ref[0] += partial


def bce_dice_loss(inputs, targets, bce_weight=0.5, dice_weight=0.5):
    assert inputs.shape == targets.shape
    # TODO(synk): the torch module runtime-asserts inputs/targets in [0, 1];
    # that data-dependent check has no clean in-kernel equivalent and is assumed.
    n_elems = inputs.size
    smooth = 1e-5

    x = inputs.reshape(-1)      # keep native dtype; cast to f32 inside kernel
    t = targets.reshape(-1)

    # Pad only when N is not lane-aligned (pad materialises a copy; the common
    # CNN case N % 128 == 0 skips it).  Zero padding contributes 0 to all sums.
    pad = (-n_elems) % LANES
    if pad:
        x = jnp.pad(x, (0, pad))
        t = jnp.pad(t, (0, pad))

    n_rows = x.size // LANES
    x2 = x.reshape(n_rows, LANES)
    t2 = t.reshape(n_rows, LANES)

    block_rows = n_rows if n_rows <= MAX_BLOCK_ROWS else MAX_BLOCK_ROWS
    n_blocks = pl.cdiv(n_rows, block_rows)
    blocks_per_core = pl.cdiv(n_blocks, NUM_CORE_SPLIT)

    def in_index_map(c, j):
        # Clamp so the DMA never targets a block past the array; duplicated
        # reads are masked out in-kernel via the global row index.
        return (jnp.minimum(c * blocks_per_core + j, n_blocks - 1), 0)

    kernel = functools.partial(
        _bce_dice_sums_kernel,
        block_rows=block_rows,
        blocks_per_core=blocks_per_core,
        n_rows=n_rows,
    )

    partials = pl.pallas_call(
        kernel,
        out_shape=jax.ShapeDtypeStruct((NUM_CORE_SPLIT, 4, LANES), jnp.float32),
        grid_spec=pl.GridSpec(
            grid=(NUM_CORE_SPLIT, blocks_per_core),
            in_specs=[
                pl.BlockSpec((block_rows, LANES), in_index_map),
                pl.BlockSpec((block_rows, LANES), in_index_map),
            ],
            out_specs=pl.BlockSpec((1, 4, LANES), lambda c, j: (c, 0, 0)),
        ),
        compiler_params=pltpu.CompilerParams(
            dimension_semantics=("parallel", "arbitrary"),
            vmem_limit_bytes=32 * 1024 * 1024,
        ),
    )(x2, t2)

    sums = jnp.sum(partials, axis=(0, 2))   # (4,): [bce_sum, inter, sum_p, sum_t]
    bce_loss = sums[0] / n_elems
    dice_loss = 1.0 - (2.0 * sums[1] + smooth) / (sums[2] + sums[3] + smooth)
    return bce_weight * bce_loss + dice_weight * dice_loss


def bce_dice_loss_ref(inputs, targets, bce_weight=0.5, dice_weight=0.5):
    p = inputs.astype(jnp.float32)
    t = targets.astype(jnp.float32)
    log_p = jnp.maximum(jnp.log(p), _LOG_CLAMP)
    log_1mp = jnp.maximum(jnp.log(1.0 - p), _LOG_CLAMP)
    bce = jnp.mean(-(t * log_p + (1.0 - t) * log_1mp))
    smooth = 1e-5
    inter = jnp.sum(p * t)
    dice = 1.0 - (2.0 * inter + smooth) / (jnp.sum(p) + jnp.sum(t) + smooth)
    return bce_weight * bce + dice_weight * dice


if __name__ == "__main__":
    key = jax.random.PRNGKey(0)
    k1, k2 = jax.random.split(key)
    # NCHW probability maps / soft targets in [0, 1], as the module expects.
    x = jax.random.uniform(k1, (2, 4, 16, 16), dtype=jnp.float32)
    y = jax.random.uniform(k2, (2, 4, 16, 16), dtype=jnp.float32)

    out = bce_dice_loss(x, y, bce_weight=0.5, dice_weight=0.5)
    out = jax.block_until_ready(out)

    ref = bce_dice_loss_ref(x, y, bce_weight=0.5, dice_weight=0.5)
    assert jnp.allclose(out, ref, rtol=1e-5, atol=1e-5), (out, ref)
    print("KERNEL_OK")
</pallas_src>

<mosaic_0001>
module attributes {stable_mosaic.version = 11 : i64} {
  func.func @_bce_dice_sums_kernel(%arg0: i32, %arg1: i32, %arg2: memref<16x128xf32, #tpu.memory_space<vmem>>, %arg3: memref<16x128xf32, #tpu.memory_space<vmem>>, %arg4: memref<1x4x128xf32, #tpu.memory_space<vmem>>) attributes {dimension_semantics = [#tpu.dimension_semantics<parallel>, #tpu.dimension_semantics<arbitrary>], iteration_bounds = array<i64: 2, 1>, scalar_prefetch = 0 : i64, scratch_operands = 0 : i64, tpu.core_type = #tpu.core_type<tc>, window_params = [{transform_indices = @transform_0, window_bounds = array<i64: 16, 128>}, {transform_indices = @transform_1, window_bounds = array<i64: 16, 128>}, {transform_indices = @transform_2, window_bounds = array<i64: 1, 4, 128>}]} {
    %c0_i32 = arith.constant 0 : i32
    %0 = arith.cmpi eq, %arg1, %c0_i32 : i32
    %1 = arith.extui %0 : i1 to i32
    %c0_i32_0 = arith.constant 0 : i32
    %2 = arith.cmpi ne, %1, %c0_i32_0 : i32
    scf.if %2 {
      %cst_21 = arith.constant 0.000000e+00 : f32
      %52 = vector.broadcast %cst_21 : f32 to vector<1x4x128xf32>
      %c0_22 = arith.constant 0 : index
      %c0_23 = arith.constant 0 : index
      %c0_24 = arith.constant 0 : index
      %53 = vector.load %arg4[%c0_22, %c0_23, %c0_24] : memref<1x4x128xf32, #tpu.memory_space<vmem>>, vector<1x4x128xf32>
      tpu.vector_store %arg4[%c0_22, %c0_23, %c0_24], %52 {strides = array<i32>} : memref<1x4x128xf32, #tpu.memory_space<vmem>>, vector<1x4x128xf32>,
    } else {
    }
    %c1_i32 = arith.constant 1 : i32
    %3 = arith.muli %arg0, %c1_i32 : i32
    %4 = arith.addi %3, %arg1 : i32
    %c16_i32 = arith.constant 16 : i32
    %5 = arith.muli %4, %c16_i32 : i32
    %6 = tpu.iota {dimensions = array<i32: 0>} : vector<16x1xi32>
    %7 = vector.broadcast %5 : i32 to vector<16x1xi32>
    %8 = arith.addi %6, %7 : vector<16x1xi32>
    %c16_i32_1 = arith.constant 16 : i32
    %9 = vector.broadcast %c16_i32_1 : i32 to vector<16x1xi32>
    %10 = arith.cmpi slt, %8, %9 : vector<16x1xi32>
    %c0 = arith.constant 0 : index
    %c0_2 = arith.constant 0 : index
    %11 = vector.load %arg2[%c0, %c0_2] : memref<16x128xf32, #tpu.memory_space<vmem>>, vector<16x128xf32>
    %cst = arith.constant 0.000000e+00 : f32
    %12 = vector.shape_cast %10 : vector<16x1xi1> to vector<16x1xi1>
    %13 = vector.broadcast %12 : vector<16x1xi1> to vector<16x128xi1>
    %14 = vector.broadcast %cst : f32 to vector<16x128xf32>
    %15 = arith.select %13, %11, %14 : vector<16x128xi1>, vector<16x128xf32>
    %c0_3 = arith.constant 0 : index
    %c0_4 = arith.constant 0 : index
    %16 = vector.load %arg3[%c0_3, %c0_4] : memref<16x128xf32, #tpu.memory_space<vmem>>, vector<16x128xf32>
    %cst_5 = arith.constant 0.000000e+00 : f32
    %17 = vector.shape_cast %10 : vector<16x1xi1> to vector<16x1xi1>
    %18 = vector.broadcast %17 : vector<16x1xi1> to vector<16x128xi1>
    %19 = vector.broadcast %cst_5 : f32 to vector<16x128xf32>
    %20 = arith.select %18, %16, %19 : vector<16x128xi1>, vector<16x128xf32>
    %21 = math.log %15 : vector<16x128xf32>
    %cst_6 = arith.constant -1.000000e+02 : f32
    %22 = vector.broadcast %cst_6 : f32 to vector<16x128xf32>
    %23 = arith.maximumf %21, %22 : vector<16x128xf32>
    %cst_7 = arith.constant 1.000000e+00 : f32
    %24 = vector.broadcast %cst_7 : f32 to vector<16x128xf32>
    %25 = arith.subf %24, %15 : vector<16x128xf32>
    %26 = math.log %25 : vector<16x128xf32>
    %cst_8 = arith.constant -1.000000e+02 : f32
    %27 = vector.broadcast %cst_8 : f32 to vector<16x128xf32>
    %28 = arith.maximumf %26, %27 : vector<16x128xf32>
    %29 = arith.mulf %20, %23 : vector<16x128xf32>
    %cst_9 = arith.constant 1.000000e+00 : f32
    %30 = vector.broadcast %cst_9 : f32 to vector<16x128xf32>
    %31 = arith.subf %30, %20 : vector<16x128xf32>
    %32 = arith.mulf %31, %28 : vector<16x128xf32>
    %33 = arith.addf %29, %32 : vector<16x128xf32>
    %cst_10 = arith.constant 0.000000e+00 : f32
    %34 = vector.broadcast %cst_10 : f32 to vector<16x128xf32>
    %35 = arith.subf %34, %33 : vector<16x128xf32>
    %cst_11 = arith.constant dense<0.000000e+00> : vector<128xf32>
    %36 = vector.multi_reduction <add>, %35, %cst_11 [0] : vector<16x128xf32> to vector<128xf32>
    %37 = vector.shape_cast %36 : vector<128xf32> to vector<1x128xf32>
    %38 = arith.mulf %15, %20 : vector<16x128xf32>
    %cst_12 = arith.constant dense<0.000000e+00> : vector<128xf32>
    %39 = vector.multi_reduction <add>, %38, %cst_12 [0] : vector<16x128xf32> to vector<128xf32>
    %40 = vector.shape_cast %39 : vector<128xf32> to vector<1x128xf32>
    %cst_13 = arith.constant dense<0.000000e+00> : vector<128xf32>
    %41 = vector.multi_reduction <add>, %15, %cst_13 [0] : vector<16x128xf32> to vector<128xf32>
    %42 = vector.shape_cast %41 : vector<128xf32> to vector<1x128xf32>
    %cst_14 = arith.constant dense<0.000000e+00> : vector<128xf32>
    %43 = vector.multi_reduction <add>, %20, %cst_14 [0] : vector<16x128xf32> to vector<128xf32>
    %44 = vector.shape_cast %43 : vector<128xf32> to vector<1x128xf32>
    %45 = tpu.concatenate %37, %40, %42, %44 in 0 : vector<1x128xf32>, vector<1x128xf32>, vector<1x128xf32>, vector<1x128xf32> -> vector<4x128xf32>
    %c0_15 = arith.constant 0 : index
    %c0_16 = arith.constant 0 : index
    %c0_17 = arith.constant 0 : index
    %46 = vector.load %arg4[%c0_15, %c0_16, %c0_17] : memref<1x4x128xf32, #tpu.memory_space<vmem>>, vector<1x4x128xf32>
    %47 = vector.shape_cast %46 : vector<1x4x128xf32> to vector<4x128xf32>
    %48 = arith.addf %47, %45 : vector<4x128xf32>
    %c0_18 = arith.constant 0 : index
    %c0_19 = arith.constant 0 : index
    %c0_20 = arith.constant 0 : index
    %49 = vector.load %arg4[%c0_18, %c0_19, %c0_20] : memref<1x4x128xf32, #tpu.memory_space<vmem>>, vector<1x4x128xf32>
    %50 = vector.shape_cast %49 : vector<1x4x128xf32> to vector<4x128xf32>
    %51 = vector.shape_cast %48 : vector<4x128xf32> to vector<1x4x128xf32>
    tpu.vector_store %arg4[%c0_18, %c0_19, %c0_20], %51 {strides = array<i32>} : memref<1x4x128xf32, #tpu.memory_space<vmem>>, vector<1x4x128xf32>,
    return
  }
  func.func @transform_0(%arg0: i32, %arg1: i32) -> (i32, i32) {
    %c1_i32 = arith.constant 1 : i32
    %0 = arith.muli %arg0, %c1_i32 : i32
    %1 = arith.addi %0, %arg1 : i32
    %c0_i32 = arith.constant 0 : i32
    %2 = arith.minsi %1, %c0_i32 : i32
    %c0_i32_0 = arith.constant 0 : i32
    %c0_i32_1 = arith.constant 0 : i32
    return %2, %c0_i32_0 : i32, i32
  }
  func.func @transform_1(%arg0: i32, %arg1: i32) -> (i32, i32) {
    %c1_i32 = arith.constant 1 : i32
    %0 = arith.muli %arg0, %c1_i32 : i32
    %1 = arith.addi %0, %arg1 : i32
    %c0_i32 = arith.constant 0 : i32
    %2 = arith.minsi %1, %c0_i32 : i32
    %c0_i32_0 = arith.constant 0 : i32
    %c0_i32_1 = arith.constant 0 : i32
    return %2, %c0_i32_0 : i32, i32
  }
  func.func @transform_2(%arg0: i32, %arg1: i32) -> (i32, i32, i32) {
    %c0_i32 = arith.constant 0 : i32
    %c0_i32_0 = arith.constant 0 : i32
    %c0_i32_1 = arith.constant 0 : i32
    return %arg0, %c0_i32, %c0_i32_0 : i32, i32, i32
  }
}

</mosaic_0001>

<bundles_post_ra>
// kernel: tpu_custom_call.1
= control target key start
LH: loop header
LB: loop body
LE: loop exit
PB: predicated region body
PF: predicated region fallthrough
CT: control target
= control target key end

     0   :  { %7 = vsyncpa [#allocation3], 0  ;;  %s941_s0 = inlined_call_operand.hbm [shape: f32[16,128], index: 0, kind: input, shape index: {}]   ;;  %s942_s1 = inlined_call_operand.hbm [shape: f32[16,128], index: 1, kind: input, shape index: {}]   ;;  %s943_s2 = inlined_call_operand.hbm [shape: f32[2,4,128], index: 2, kind: output, shape index: {}]  }
   0x1   :  { %9 = vsyncpa [#allocation3 + $0x1], 0 }
   0x2   :  { %10 = vsyncpa [#allocation6], 0 }
   0x3   :  { %12 = vsyncpa [#allocation6 + $0x1], 0 }
   0x4   :  { %13 = vsyncpa [#allocation4], 0 }
   0x5   :  { %15 = vsyncpa [#allocation4 + $0x1], 0  ;;  %s752_s9 = smov 0   ;;  %s754_s10 = smov 0  }
   0x6   :  { %s756_s11 = smov 0   ;;  %s758_s12 = smov 0  }
   0x7   :  { %s760_s13 = smov 0   ;;  %s762_s14 = smov 0  }
   0x8   :  { %s764_s15 = smov 0   ;;  %s766_s16 = smov 0  }
   0x9 LB: > { %s445_s17 = sadd.s32 4294967295, %s729_s16   ;;  %s446_s18 = sadd.s32 4294967294, %s729_s16   ;;  %s729_s16 = sphi %s766_s16, %s21_s16   ;;  %s725_s15 = sphi %s764_s15, %s962_s15   ;;  %s721_s14 = sphi %s762_s14, %s961_s14   ;;  %s717_s13 = sphi %s760_s13, %s931_s13   ;;  %s713_s12 = sphi %s758_s12, %s960_s12   ;;  %s709_s11 = sphi %s756_s11, %s959_s11   ;;  %s705_s10 = sphi %s754_s10, %s958_s10   ;;  %s701_s9 = sphi %s752_s9, %s957_s9  }
   0xa   : > { %s33_s19 = sadd.s32 1, %s725_s15  ;;  %p698_p1 = scmp.ne.s32.totalorder %s717_s13, 0 }
   0xb   : > { %p35_p0 = scmp.ge.s32.totalorder %s33_s19, 2  ;;  %p54_p2 = scmp.eq.s32.totalorder %s729_s16, 0 }
   0xc   : > { %p59_p3 = scmp.ne.s32.totalorder %s717_s13, %s713_s12  ;;  %p60_p5 = scmp.eq.s32.totalorder %s445_s17, 0 }
   0xd   : > { %s964_s19 = smov (%p35_p0, %s33_s19), 0  ;;  %p798_p4 = por %p698_p1, %p54_p2 }
   0xe   : > { %p802_p6 = por %p60_p5, %p59_p3  ;;  %s101_s22 = ssub.s32 %s725_s15, %s964_s19 }
   0xf   : > { %p102_p7 = scmp.eq.s32.totalorder %s101_s22, 0  ;;  %s104_s23 = sadd.s32 1, %s709_s11 }
  0x10   : > { %s947_s21 = scalar_select %p802_p6, 1, 0 }
  0x11   : > { %s810_s24 = scalar_select %p102_p7, %s709_s11, %s104_s23  }
  0x12   : > { %p114_p8 = scmp.ne.s32.totalorder %s709_s11, %s705_s10  ;;  %p115_p9 = scmp.eq.s32.totalorder %s445_s17, 1 }
  0x13   : > { %p120_p10 = scmp.ne.s32.totalorder %s705_s10, %s701_s9  ;;  %p121_p11 = scmp.eq.s32.totalorder %s446_s18, 1 }
  0x14   : > { %p816_p12 = por %p115_p9, %p114_p8  ;;  %p483_p1 = scmp.lt.s32.totalorder %s729_s16, 2 }
  0x15   : > { %p821_p0 = por %p121_p11, %p120_p10  ;;  %s731_s27 = smov [#allocation2]  }
  0x16   : > { %s948_s25 = scalar_select %p816_p12, 1, 0 }
  0x17   : > { %s949_s26 = scalar_select %p821_p0, 1, 0 }
  0x18   : > { %s155_s28 = sshll.u32 %s731_s27, 4  ;;  %p828_p2 = pnand %p483_p1, %p798_p4  ;;  %s156_s28 = int_to_ptr.vmem [resolvable:$true] %s155_s28 }
  0x19   : > { %s568_s4 = scalar_lea.hbm %s941_s0, 256 }
  0x1a   : > { %p569_p3 = scmp.ne.s32.totalorder %s941_s0, %s568_s4  ;;  %p570_p5 = pneg %p828_p2 }
  0x1b   : > { %p575_p8 = scmp.lt.s32.totalorder %s568_s4, %s568_s4 }
  0x1c   : > { %p571_p7 = pnand %p570_p5, %p569_p3 }
  0x1e   : > { %p572_p4 = pneg %p571_p7 }
  0x20   : > { %p577_p9 = pnand %p575_p8, %p572_p4 }
  0x22   : > { %580 = shalt.err (!%p577_p9)
}
  0x23   : > { %s581_s7 = scalar_lea.vmem %s156_s28, 256  ;;  %s588_s8 = scalar_lea.vmem %s156_s28, 512 }
  0x24   : > { %p582_p10 = scmp.ne.s32.totalorder %s156_s28, %s581_s7  ;;  %p589_p13 = scmp.lt.s32.totalorder %s156_s28, %s156_s28 }
  0x25   : > { %p590_p0 = scmp.lt.s32.totalorder %s588_s8, %s581_s7 }
  0x26   : > { %p584_p11 = pnand %p582_p10, %p570_p5 }
  0x27   : > { %p591_p12 = por %p590_p0, %p589_p13 }
  0x28   : > { %p585_p1 = pneg %p584_p11 }
  0x2a   : > { %p592_p6 = pnand %p591_p12, %p585_p1 }
  0x2c   : > { %595 = shalt.err (!%p592_p6)
}
  0x2d   : > { %s732_s12 = smov 128   ;;  %s733_s17 = smov 8  }
  0x2e   : > { %475 = dma.hbm_to_vmem [thread:$0]  (!%p828_p2), %s941_s0, 256, %s156_s28, [#allocation3], %s732_s12, %s732_s12, %s733_s17  }
  0x2f   : > { %p455_p3 = scmp.ge.s32.totalorder %s729_s16, 1  ;;  %p187_p7 = scmp.lt.s32.totalorder %s729_s16, 3 }
  0x30   : > { %s734_s23 = smov [#allocation5]   ;;  %s596_s4 = scalar_lea.hbm %s942_s1, 256 }
  0x31   : > { %p853_p4 = pnand %p455_p3, %p187_p7  ;;  %s179_s27 = sshll.u32 %s734_s23, 4  ;;  %s180_s27 = int_to_ptr.vmem [resolvable:$true] %s179_s27 }
  0x32   : > { %p597_p6 = scmp.ne.s32.totalorder %s942_s1, %s596_s4  ;;  %p603_p0 = scmp.lt.s32.totalorder %s596_s4, %s596_s4 }
  0x33   : > { %s951_s22 = scalar_select %p853_p4, 1, 0 }
  0x34   : > { %p599_p12 = pnand %p597_p6, %p570_p5 }
  0x36   : > { %p600_p13 = pneg %p599_p12 }
  0x38   : > { %p605_p8 = pnand %p603_p0, %p600_p13 }
  0x3a   : > { %608 = shalt.err (!%p605_p8)
}
  0x3b   : > { %s609_s28 = scalar_lea.vmem %s180_s27, 256  ;;  %s616_s7 = scalar_lea.vmem %s180_s27, 512 }
  0x3c   : > { %p610_p9 = scmp.ne.s32.totalorder %s180_s27, %s609_s28  ;;  %p617_p1 = scmp.lt.s32.totalorder %s180_s27, %s180_s27 }
  0x3d   : > { %p618_p3 = scmp.lt.s32.totalorder %s616_s7, %s609_s28 }
  0x3e   : > { %p612_p10 = pnand %p610_p9, %p570_p5 }
  0x3f   : > { %p619_p7 = por %p618_p3, %p617_p1 }
  0x40   : > { %p613_p11 = pneg %p612_p10 }
  0x42   : > { %p620_p4 = pnand %p619_p7, %p613_p11 }
  0x44   : > { %623 = shalt.err (!%p620_p4)
}
  0x45   : > { %478 = dma.hbm_to_vmem [thread:$0]  (!%p828_p2), %s942_s1, 256, %s180_s27, [#allocation6], %s732_s12, %s732_s12, %s733_s17  }
  0x46   : > { %p952_p6 = scmp.ne.s32.totalorder %s951_s22, 0 }
  0x47   : > { %s193_s20 = sand.u32 (!%p952_p6), 1, %s717_s13   ;;  %p953_p5 = scmp.ne.s32.totalorder (!%p952_p6), %s947_s21, 0 }
  0x48   : > { %191 = sbr.rel (%p952_p6) target bundleno = 148 (0x94), region = 28  ;;  %s456_s23 = sshll.u32 (!%p952_p6), %s193_s20, 4 }
  0x49   : > { %s194_s30 = scalar_lea.sflag (!%p952_p6), [#allocation3], %s193_s20  ;;  %s197_s3 = scalar_lea.vmem (!%p952_p6), [#allocation2], %s456_s23 }
  0x4d   : > { %687 = dma.done.wait (%p953_p5), %s194_s30, 256  }
  0x4e   : > { %689 = vsyncadd (%p953_p5), %s194_s30, 4294967040  ;;  %s203_s29 = scalar_lea.sflag [#allocation6], %s193_s20  ;;  %s206_s4 = scalar_lea.vmem [#allocation5], %s456_s23 }
  0x4f   : > { %691 = dma.done.wait (%p953_p5), %s203_s29, 256  }
  0x50   : > { %693 = vsyncadd (%p953_p5), %s203_s29, 4294967040  ;;  %s229_s12 = sand.u32 1, %s705_s10   ;;  %s459_s17 = sshll.u32 %s721_s14, 4  ;;  %v247_v0 = vlaneseq  ;;  %v735_v3 = vmov 0.0   ;;  %v255_v7 = vld [vmem:[%s197_s3] sm:$0xff]  ;;  %v256_v8 = vld [vmem:[%s197_s3 + $0x8] sm:$0xff] }
  0x51   : > { %s458_s22 = sshll.u32 %s229_s12, 2  ;;  %v250_v1 = vstv %s459_s17  ;;  %v263_v13 = vld [vmem:[%s206_s4] sm:$0xff]  ;;  %v264_v14 = vld [vmem:[%s206_s4 + $0x8] sm:$0xff]  ;;  %vm321_vm2 = vcmask 1040384   ;;  %vm323_vm3 = vcmask 1041408   ;;  %vm325_vm4 = vcmask 1042432  }
  0x52   : > { %v248_v2 = vshrl.u32 %v247_v0, 7  ;;  %s889_s27 = scalar_lea.vmem [#allocation7], %s458_s22  ;;  %s461_s21 = sshll.u32 %s721_s14, 6 }
  0x53   : > { %244 = vst [vmem:[%s889_s27] sm:$0xf] %v735_v3  ;;  %s344_s5 = sshll.u32 %s889_s27, 4  ;;  %s342_s7 = scalar_lea.hbm %s943_s2, %s461_s21  ;;  %s345_s5 = int_to_ptr.vmem [resolvable:$true] %s344_s5 }
  0x54   : > { %v249_v4 = vadd.s32 8, %v248_v2  ;;  %v251_v5 = vadd.s32 %v250_v1, %v248_v2  ;;  %s331_s8 = scalar_lea.sflag [#allocation4], %s229_s12  ;;  %s624_s18 = scalar_lea.vmem %s345_s5, 64 }
  0x55   : > { %p625_p2 = scmp.ne.s32.totalorder %s345_s5, %s624_s18  ;;  %p954_p4 = scmp.ne.s32.totalorder %s948_s25, 0 }
  0x56   : > { %v252_v6 = vadd.s32 %v250_v1, %v249_v4  ;;  %vm253_vm0 = vcmp.lt.s32.totalorder %v251_v5, 16  ;;  %s736_s20 = smov [#allocation7]  }
  0x57   : > { %v261_v9 = vsel %vm253_vm0, %v255_v7, 0.0  ;;  %v265_v15 = vsel %vm253_vm0, %v263_v13, 0.0  ;;  %p626_p12 = pnand %p625_p2, %p954_p4  ;;  %s628_s23 = sshll.u32 %s736_s20, 4  ;;  %s629_s23 = int_to_ptr.vmem [resolvable:$false] %s628_s23 }
  0x58   : > { %vm254_vm1 = vcmp.lt.s32.totalorder %v252_v6, 16  ;;  %560 = vlog2.f32 %v261_v9  ;;  %v273_v11 = vsub.f32 1.0, %v261_v9  ;;  %v298_v17 = vmul.f32 %v265_v15, %v261_v9  ;;  %s630_s14 = scalar_lea.vmem %s629_s23, 128  ;;  %p631_p0 = scmp.lt.s32.totalorder %s345_s5, %s629_s23 }
  0x59   : > { %v262_v10 = vsel %vm254_vm1, %v256_v8, 0.0  ;;  %v266_v16 = vsel %vm254_vm1, %v264_v14, 0.0  ;;  %v283_v30 = vsub.f32 1.0, %v265_v15  ;;  %p627_p13 = pneg %p626_p12  ;;  %p632_p8 = scmp.lt.s32.totalorder %s630_s14, %s624_s18 }
  0x5a   : > { %562 = vlog2.f32 %v262_v10  ;;  %v274_v12 = vsub.f32 1.0, %v262_v10  ;;  %v299_v18 = vmul.f32 %v266_v16, %v262_v10  ;;  %v307_v23 = vadd.f32 %v262_v10, %v261_v9  ;;  %v327_v6 = vld [vmem:[%s889_s27] sm:$0xf] }
  0x5b   : > { %564 = vlog2.f32 %v273_v11  ;;  %v314_v26 = vadd.f32 %v266_v16, %v265_v15  ;;  %v284_v33 = vsub.f32 1.0, %v266_v16  ;;  %p633_p9 = por %p632_p8, %p631_p0 }
  0x5c   : > { %566 = vlog2.f32 %v274_v12  ;;  %v300_v20 = vadd.f32 %v299_v18, %v298_v17  ;;  %v308_v37 = vrot.slane %v307_v23, 4 }
  0x5d   : > { %v315_v40 = vrot.slane %v314_v26, 4  ;;  %p634_p10 = pnand %p633_p9, %p627_p13 }
  0x5e   : > { %v301_v34 = vrot.slane %v300_v20, 4  ;;  %v309_v45 = vadd.f32 %v308_v37, %v307_v23 }
  0x5f   : > { %v316_v47 = vadd.f32 %v315_v40, %v314_v26 }
  0x60   : > { %v302_v43 = vadd.f32 %v301_v34, %v300_v20  ;;  %v310_v51 = vrot.slane %v309_v45, 2 }
  0x61   : > { %v317_v53 = vrot.slane %v316_v47, 2 }
  0x62   : > { %v303_v50 = vrot.slane %v302_v43, 2  ;;  %v311_v56 = vadd.f32 %v310_v51, %v309_v45 }
  0x63   : > { %v318_v58 = vadd.f32 %v317_v53, %v316_v47 }
  0x64   : > { %v304_v55 = vadd.f32 %v303_v50, %v302_v43  ;;  %v312_v61 = vrot.slane %v311_v56, 1 }
  0x65   : > { %v561_v19 = vpop.eup %560  ;;  %v319_v63 = vrot.slane %v318_v58, 1 }
  0x66   : > { %v268_v22 = vmul.f32 0.6931472, %v561_v19  ;;  %v305_v60 = vrot.slane %v304_v55, 1  ;;  %v313_v2 = vadd.f32 %v312_v61, %v311_v56 }
  0x67   : > { %v563_v21 = vpop.eup %562  ;;  %v320_v4 = vadd.f32 %v319_v63, %v318_v58 }
  0x68   : > { %v565_v24 = vpop.eup %564  ;;  %v270_v25 = vmul.f32 0.6931472, %v563_v21  ;;  %v271_v28 = vmax.f32 %v268_v22, -100.0  ;;  %v306_v1 = vadd.f32 %v305_v60, %v304_v55 }
  0x69   : > { %v567_v27 = vpop.eup %566  ;;  %v276_v29 = vmul.f32 0.6931472, %v565_v24 }
  0x6a   : > { %v272_v31 = vmax.f32 %v270_v25, -100.0  ;;  %v278_v32 = vmul.f32 0.6931472, %v567_v27  ;;  %v281_v36 = vmul.f32 %v271_v28, %v265_v15 }
  0x6b   : > { %v279_v35 = vmax.f32 %v276_v29, -100.0 }
  0x6c   : > { %v280_v38 = vmax.f32 %v278_v32, -100.0  ;;  %v282_v39 = vmul.f32 %v272_v31, %v266_v16 }
  0x6d   : > { %v285_v41 = vmul.f32 %v283_v30, %v279_v35 }
  0x6e   : > { %v286_v42 = vmul.f32 %v284_v33, %v280_v38 }
  0x6f   : > { %v287_v44 = vadd.f32 %v285_v41, %v281_v36 }
  0x70   : > { %v288_v46 = vadd.f32 %v286_v42, %v282_v39 }
  0x71   : > { %v289_v48 = vsub.f32 0.0, %v287_v44 }
  0x72   : > { %v290_v49 = vsub.f32 0.0, %v288_v46 }
  0x74   : > { %v291_v52 = vadd.f32 %v290_v49, %v289_v48 }
  0x76   : > { %v292_v54 = vrot.slane %v291_v52, 4 }
  0x78   : > { %v293_v57 = vadd.f32 %v292_v54, %v291_v52 }
  0x7a   : > { %v294_v59 = vrot.slane %v293_v57, 2 }
  0x7c   : > { %v295_v62 = vadd.f32 %v294_v59, %v293_v57 }
  0x7e   : > { %v296_v0 = vrot.slane %v295_v62, 1 }
  0x80   : > { %v297_v3 = vadd.f32 %v296_v0, %v295_v62 }
  0x82   : > { %v322_v5 = vsel %vm321_vm2, %v297_v3, %v306_v1 }
  0x83   : > { %v324_v7 = vsel %vm323_vm3, %v322_v5, %v313_v2 }
  0x84   : > { %v326_v8 = vsel %vm325_vm4, %v324_v7, %v320_v4 }
  0x85   : > { %v328_v9 = vadd.f32 %v327_v6, %v326_v8 }
  0x87   : > { %329 = vst [vmem:[%s889_s27] sm:$0xf] %v328_v9 }
  0x88   : > { %637 = shalt.err (!%p634_p10)
}
  0x89   : > { %s638_s30 = scalar_lea.hbm %s342_s7, 64  ;;  %s642_s4 = scalar_lea.hbm %s943_s2, 128 }
  0x8a   : > { %p639_p11 = scmp.ne.s32.totalorder %s342_s7, %s638_s30  ;;  %p643_p7 = scmp.lt.s32.totalorder %s342_s7, %s943_s2 }
  0x8b   : > { %p644_p6 = scmp.lt.s32.totalorder %s642_s4, %s638_s30 }
  0x8c   : > { %p640_p1 = pnand %p639_p11, %p954_p4 }
  0x8d   : > { %p645_p5 = por %p644_p6, %p643_p7 }
  0x8e   : > { %p641_p3 = pneg %p640_p1 }
  0x90   : > { %p646_p2 = pnand %p645_p5, %p641_p3 }
  0x92   : > { %649 = shalt.err (!%p646_p2)
}
  0x93   : > { %470 = dma.vmem_to_hbm [thread:$0]  (%p954_p4), %s345_s5, 64, %s342_s7, %s331_s8  }
  0x94 PF: > { %s356_s22 = sand.u32 1, %s701_s9   ;;  %p955_p12 = scmp.ne.s32.totalorder %s949_s26, 0 }
  0x95   : > { %p956_p13 = scmp.ge.s32.totalorder %s729_s16, 2  ;;  %s357_s27 = scalar_lea.sflag [#allocation4], %s356_s22 }
  0x97   : > { %p480_p0 = pnand %p956_p13, %p955_p12 }
  0x99   : > { %p481_p8 = pneg %p480_p0 }
  0x9b   : > { %695 = dma.done.wait (%p481_p8), %s357_s27, 64  }
  0x9c   : > { %697 = vsyncadd (%p481_p8), %s357_s27, 4294967232  ;;  %s21_s16 = sadd.s32 1, %s729_s16   ;;  %s957_s9 = smov %s705_s10 }
  0x9d   : > { %p18_p9 = scmp.ge.s32.totalorder %s21_s16, 4   ;;  %s958_s10 = smov %s709_s11 }
  0x9e   : > { %s959_s11 = smov %s810_s24  ;;  %s960_s12 = smov %s717_s13 }
  0x9f   : > { %s931_s13 = smov 0   ;;  %s961_s14 = smov %s725_s15 }
  0xa0   : > { %s962_s15 = smov %s964_s19  ;;  %20 = sbr.rel (!%p18_p9) target bundleno = 9 (0x9), region = 90 }
  0xa5   :  { %362 = vsyncpa [#allocation3], 1 }
  0xa6   :  { %364 = vsyncpa [#allocation3 + $0x1], 1 }
  0xa7   :  { %365 = vsyncpa [#allocation6], 1 }
  0xa8   :  { %367 = vsyncpa [#allocation6 + $0x1], 1 }
  0xa9   :  { %368 = vsyncpa [#allocation4], 1 }
  0xaa   :  { %370 = vsyncpa [#allocation4 + $0x1], 1 }

</bundles_post_ra>
